<compile_context>
chip_gen: v6e
topology: v6e:2x2x1
jax: 0.10.0
libtpu: 0.0.40
codegen_flags: <defaults>
</compile_context>

<pallas_src>
import functools

import jax
import jax.numpy as jnp
from jax.experimental import pallas as pl
from jax.experimental.pallas import tpu as pltpu  # noqa: F401  (TPU backend import)


def _fused_opm_kernel(x_ref, w1a_ref, b1a_ref, wm_ref, bm_ref,
                      w2_ref, b2_ref, g_ref, beta_ref, o_ref, *, n_valid, eps):
    # x_ref: (Bp, T*C) with x[b, t*C + c]; padded rows (b >= n_valid) are zero.
    x = x_ref[...]

    # --- stage 1: projection + (folded) outer-product mean --------------------
    # out1[b, t*H+h] = Linear1_1(x)[b,t,h]     (block-diagonal weight)
    # m   [b, t*H+h] = mean_h'(Linear1_2(x)[b,t,h'])   (mean folded into weight)
    out1 = jnp.dot(x, w1a_ref[...], preferred_element_type=jnp.float32) + b1a_ref[...]
    m = jnp.dot(x, wm_ref[...], preferred_element_type=jnp.float32) + bm_ref[...]
    prod = out1 * m                                   # (Bp, T*H), stays in vregs

    # --- stage 2: Linear2 on the flattened intermediate (single K=T*H dot) ----
    y = jnp.dot(prod, w2_ref[...], preferred_element_type=jnp.float32) + b2_ref[...]

    # --- BatchNorm1d, training mode: batch mean, biased variance --------------
    # Padded rows (b >= n_valid) are excluded from the statistics.
    Bp, Fp = y.shape
    row = jax.lax.broadcasted_iota(jnp.int32, (Bp, Fp), 0)
    mask = (row < n_valid).astype(jnp.float32)
    inv_n = 1.0 / float(n_valid)
    mu = jnp.sum(y * mask, axis=0, keepdims=True) * inv_n
    d = (y - mu) * mask
    var = jnp.sum(d * d, axis=0, keepdims=True) * inv_n
    o_ref[...] = (y - mu) * jax.lax.rsqrt(var + eps) * g_ref[...] + beta_ref[...]
    # TODO(synk): running_mean / running_var buffer updates (stateful training
    # bookkeeping) are not emitted; they do not affect the forward output.


def outer_product_mean(x, params, *, ic, tp, hidden, eps=1e-5):
    B, T, C = x.shape
    assert T == tp and C == ic
    w1a, b1a, w1b, b1b, w2, b2, gamma, beta = params
    H = hidden
    F = ic * ic

    Bp = max(8, ((B + 7) // 8) * 8)          # sublane-padded batch
    Fp = max(128, ((F + 127) // 128) * 128)  # lane-dense output width

    f32 = jnp.float32

    # Fold mean_h(out2) into the weights (exact up to FP reassociation).
    w1b_mean = jnp.mean(w1b, axis=1, keepdims=True)        # (C, 1)
    b1b_mean = jnp.mean(b1b)                               # scalar

    # Block-diagonal stage-1 weights so out1 / m come out of the MXU already
    # in the flattened (b, t*H + h) layout used by Linear2.  One-time layout
    # plumbing in plain XLA; in a real model these would be precomputed once.
    eye = jnp.eye(T, dtype=f32)
    w1a_bd = jnp.einsum('tu,ch->tcuh', eye, w1a.astype(f32)).reshape(T * C, T * H)
    wm_bd = jnp.einsum('tu,ch->tcuh', eye,
                       jnp.broadcast_to(w1b_mean, (C, H)).astype(f32)).reshape(T * C, T * H)
    b1a_t = jnp.tile(b1a.reshape(1, H).astype(f32), (1, T))     # (1, T*H)
    bm_t = jnp.full((1, T * H), b1b_mean, f32)                  # (1, T*H)

    # Sublane-padded input, lane-padded Linear2 / BN parameters and output.
    x2 = jnp.zeros((Bp, T * C), f32).at[:B].set(x.reshape(B, T * C).astype(f32))
    w2p = jnp.zeros((T * H, Fp), f32).at[:, :F].set(w2.astype(f32))
    b2p = jnp.zeros((1, Fp), f32).at[:, :F].set(b2.astype(f32))
    gp = jnp.zeros((1, Fp), f32).at[:, :F].set(gamma.astype(f32))
    bp = jnp.zeros((1, Fp), f32).at[:, :F].set(beta.astype(f32))

    out = pl.pallas_call(
        functools.partial(_fused_opm_kernel, n_valid=B, eps=eps),
        out_shape=jax.ShapeDtypeStruct((Bp, Fp), f32),
    )(x2, w1a_bd, b1a_t, wm_bd, bm_t, w2p, b2p, gp, bp)

    return out[:B, :F].reshape(B, ic, ic)


def _ref_forward(x, params, *, ic, eps=1e-5):
    """Pure-JAX reference that follows the PyTorch ops literally."""
    w1a, b1a, w1b, b1b, w2, b2, gamma, beta = params
    out1 = x @ w1a + b1a                                            # (B, T, H)
    out2 = x @ w1b + b1b                                            # (B, T, H)
    o = (out1[..., :, None] * out2[..., None, :]).mean(axis=3)      # (B, T, H)
    flat = o.reshape(x.shape[0], -1)
    y = flat @ w2 + b2
    mu = y.mean(axis=0, keepdims=True)
    var = ((y - mu) ** 2).mean(axis=0, keepdims=True)
    y = (y - mu) / jnp.sqrt(var + eps) * gamma + beta
    return y.reshape(x.shape[0], ic, ic)


if __name__ == "__main__":
    # Small shapes consistent with the module's forward: x is (B, tp, ic).
    B, TP, IC, H = 2, 16, 8, 32

    key = jax.random.PRNGKey(0)
    ks = jax.random.split(key, 9)
    scale = 0.1
    params = (
        scale * jax.random.normal(ks[0], (IC, H), jnp.float32),            # W1_1^T
        scale * jax.random.normal(ks[1], (1, H), jnp.float32),             # b1_1
        scale * jax.random.normal(ks[2], (IC, H), jnp.float32),            # W1_2^T
        scale * jax.random.normal(ks[3], (1, H), jnp.float32),             # b1_2
        scale * jax.random.normal(ks[4], (TP * H, IC * IC), jnp.float32),  # W2^T
        scale * jax.random.normal(ks[5], (1, IC * IC), jnp.float32),       # b2
        1.0 + scale * jax.random.normal(ks[6], (1, IC * IC), jnp.float32), # bn gamma
        scale * jax.random.normal(ks[7], (1, IC * IC), jnp.float32),       # bn beta
    )
    x = jax.random.normal(ks[8], (B, TP, IC), jnp.float32)

    out = outer_product_mean(x, params, ic=IC, tp=TP, hidden=H)
    out = jax.block_until_ready(out)

    ref = _ref_forward(x, params, ic=IC)
    assert out.shape == (B, IC, IC), out.shape
    assert jnp.allclose(out, ref, rtol=1e-4, atol=1e-4), float(jnp.max(jnp.abs(out - ref)))

    print("KERNEL_OK")
</pallas_src>

<mosaic_0001>
module attributes {stable_mosaic.version = 11 : i64} {
  func.func @_fused_opm_kernel(%arg0: memref<8x128xf32, #tpu.memory_space<vmem>>, %arg1: memref<128x512xf32, #tpu.memory_space<vmem>>, %arg2: memref<1x512xf32, #tpu.memory_space<vmem>>, %arg3: memref<128x512xf32, #tpu.memory_space<vmem>>, %arg4: memref<1x512xf32, #tpu.memory_space<vmem>>, %arg5: memref<512x128xf32, #tpu.memory_space<vmem>>, %arg6: memref<1x128xf32, #tpu.memory_space<vmem>>, %arg7: memref<1x128xf32, #tpu.memory_space<vmem>>, %arg8: memref<1x128xf32, #tpu.memory_space<vmem>>, %arg9: memref<8x128xf32, #tpu.memory_space<vmem>>) attributes {dimension_semantics = [], scalar_prefetch = 0 : i64, scratch_operands = 0 : i64, tpu.core_type = #tpu.core_type<tc>} {
    %c0 = arith.constant 0 : index
    %c0_0 = arith.constant 0 : index
    %0 = vector.load %arg0[%c0, %c0_0] : memref<8x128xf32, #tpu.memory_space<vmem>>, vector<8x128xf32>
    %c0_1 = arith.constant 0 : index
    %c0_2 = arith.constant 0 : index
    %1 = vector.load %arg1[%c0_1, %c0_2] : memref<128x512xf32, #tpu.memory_space<vmem>>, vector<128x512xf32>
    %cst = arith.constant dense<0.000000e+00> : vector<8x512xf32>
    %2 = tpu.matmul %0, %1, %cst {dimension_numbers = #tpu.dot_dimension_numbers<[1], [0], [0], [1], [0, 0, 1, 1], [], []>} : vector<8x128xf32>, vector<128x512xf32>, vector<8x512xf32> -> vector<8x512xf32>
    %c0_3 = arith.constant 0 : index
    %c0_4 = arith.constant 0 : index
    %3 = vector.load %arg2[%c0_3, %c0_4] : memref<1x512xf32, #tpu.memory_space<vmem>>, vector<1x512xf32>
    %4 = vector.broadcast %3 : vector<1x512xf32> to vector<8x512xf32>
    %5 = arith.addf %2, %4 : vector<8x512xf32>
    %c0_5 = arith.constant 0 : index
    %c0_6 = arith.constant 0 : index
    %6 = vector.load %arg3[%c0_5, %c0_6] : memref<128x512xf32, #tpu.memory_space<vmem>>, vector<128x512xf32>
    %cst_7 = arith.constant dense<0.000000e+00> : vector<8x512xf32>
    %7 = tpu.matmul %0, %6, %cst_7 {dimension_numbers = #tpu.dot_dimension_numbers<[1], [0], [0], [1], [0, 0, 1, 1], [], []>} : vector<8x128xf32>, vector<128x512xf32>, vector<8x512xf32> -> vector<8x512xf32>
    %c0_8 = arith.constant 0 : index
    %c0_9 = arith.constant 0 : index
    %8 = vector.load %arg4[%c0_8, %c0_9] : memref<1x512xf32, #tpu.memory_space<vmem>>, vector<1x512xf32>
    %9 = vector.broadcast %8 : vector<1x512xf32> to vector<8x512xf32>
    %10 = arith.addf %7, %9 : vector<8x512xf32>
    %11 = arith.mulf %5, %10 : vector<8x512xf32>
    %c0_10 = arith.constant 0 : index
    %c0_11 = arith.constant 0 : index
    %12 = vector.load %arg5[%c0_10, %c0_11] : memref<512x128xf32, #tpu.memory_space<vmem>>, vector<512x128xf32>
    %cst_12 = arith.constant dense<0.000000e+00> : vector<8x128xf32>
    %13 = tpu.matmul %11, %12, %cst_12 {dimension_numbers = #tpu.dot_dimension_numbers<[1], [0], [0], [1], [0, 0, 1, 1], [], []>} : vector<8x512xf32>, vector<512x128xf32>, vector<8x128xf32> -> vector<8x128xf32>
    %c0_13 = arith.constant 0 : index
    %c0_14 = arith.constant 0 : index
    %14 = vector.load %arg6[%c0_13, %c0_14] : memref<1x128xf32, #tpu.memory_space<vmem>>, vector<1x128xf32>
    %15 = vector.broadcast %14 : vector<1x128xf32> to vector<8x128xf32>
    %16 = arith.addf %13, %15 : vector<8x128xf32>
    %17 = tpu.iota {dimensions = array<i32: 0>} : vector<8x128xi32>
    %c2_i32 = arith.constant 2 : i32
    %18 = vector.broadcast %c2_i32 : i32 to vector<8x128xi32>
    %19 = arith.cmpi slt, %17, %18 : vector<8x128xi32>
    %20 = arith.extui %19 : vector<8x128xi1> to vector<8x128xi32>
    %21 = arith.sitofp %20 : vector<8x128xi32> to vector<8x128xf32>
    %22 = arith.mulf %16, %21 : vector<8x128xf32>
    %cst_15 = arith.constant dense<0.000000e+00> : vector<128xf32>
    %23 = vector.multi_reduction <add>, %22, %cst_15 [0] : vector<8x128xf32> to vector<128xf32>
    %24 = vector.shape_cast %23 : vector<128xf32> to vector<1x128xf32>
    %cst_16 = arith.constant 5.000000e-01 : f32
    %25 = vector.broadcast %cst_16 : f32 to vector<1x128xf32>
    %26 = arith.mulf %24, %25 : vector<1x128xf32>
    %27 = vector.broadcast %26 : vector<1x128xf32> to vector<8x128xf32>
    %28 = arith.subf %16, %27 : vector<8x128xf32>
    %29 = arith.mulf %28, %21 : vector<8x128xf32>
    %30 = arith.mulf %29, %29 : vector<8x128xf32>
    %cst_17 = arith.constant dense<0.000000e+00> : vector<128xf32>
    %31 = vector.multi_reduction <add>, %30, %cst_17 [0] : vector<8x128xf32> to vector<128xf32>
    %32 = vector.shape_cast %31 : vector<128xf32> to vector<1x128xf32>
    %cst_18 = arith.constant 5.000000e-01 : f32
    %33 = vector.broadcast %cst_18 : f32 to vector<1x128xf32>
    %34 = arith.mulf %32, %33 : vector<1x128xf32>
    %35 = vector.broadcast %26 : vector<1x128xf32> to vector<8x128xf32>
    %36 = arith.subf %16, %35 : vector<8x128xf32>
    %cst_19 = arith.constant 9.99999974E-6 : f32
    %37 = vector.broadcast %cst_19 : f32 to vector<1x128xf32>
    %38 = arith.addf %34, %37 : vector<1x128xf32>
    %39 = math.rsqrt %38 : vector<1x128xf32>
    %40 = vector.broadcast %39 : vector<1x128xf32> to vector<8x128xf32>
    %41 = arith.mulf %36, %40 : vector<8x128xf32>
    %c0_20 = arith.constant 0 : index
    %c0_21 = arith.constant 0 : index
    %42 = vector.load %arg7[%c0_20, %c0_21] : memref<1x128xf32, #tpu.memory_space<vmem>>, vector<1x128xf32>
    %43 = vector.broadcast %42 : vector<1x128xf32> to vector<8x128xf32>
    %44 = arith.mulf %41, %43 : vector<8x128xf32>
    %c0_22 = arith.constant 0 : index
    %c0_23 = arith.constant 0 : index
    %45 = vector.load %arg8[%c0_22, %c0_23] : memref<1x128xf32, #tpu.memory_space<vmem>>, vector<1x128xf32>
    %46 = vector.broadcast %45 : vector<1x128xf32> to vector<8x128xf32>
    %47 = arith.addf %44, %46 : vector<8x128xf32>
    %c0_24 = arith.constant 0 : index
    %c0_25 = arith.constant 0 : index
    %48 = vector.load %arg9[%c0_24, %c0_25] : memref<8x128xf32, #tpu.memory_space<vmem>>, vector<8x128xf32>
    tpu.vector_store %arg9[%c0_24, %c0_25], %47 {strides = array<i32>} : memref<8x128xf32, #tpu.memory_space<vmem>>, vector<8x128xf32>,
    return
  }
}

</mosaic_0001>

<bundles_post_ra>
// kernel: tpu_custom_call.1
= control target key start
LH: loop header
LB: loop body
LE: loop exit
PB: predicated region body
PF: predicated region fallthrough
CT: control target
= control target key end

     0   :  { %14 = vsyncpa [#allocation3], 0  ;;  %s1146_s0 = inlined_call_operand.hbm [shape: f32[8,128], index: 0, kind: input, shape index: {}]   ;;  %s1147_s1 = inlined_call_operand.hbm [shape: f32[128,512], index: 1, kind: input, shape index: {}]   ;;  %s1148_s2 = inlined_call_operand.hbm [shape: f32[1,512], index: 2, kind: input, shape index: {}]   ;;  %s1149_s3 = inlined_call_operand.hbm [shape: f32[128,512], index: 3, kind: input, shape index: {}]   ;;  %s1150_s4 = inlined_call_operand.vmem [shape: f32[1,512], index: 4, kind: input, shape index: {}]   ;;  %s1151_s5 = inlined_call_operand.hbm [shape: f32[512,128], index: 5, kind: input, shape index: {}]   ;;  %s1152_s6 = inlined_call_operand.vmem [shape: f32[1,128], index: 6, kind: input, shape index: {}]   ;;  %s1153_s7 = inlined_call_operand.vmem [shape: f32[1,128], index: 7, kind: input, shape index: {}]   ;;  %s1154_s8 = inlined_call_operand.vmem [shape: f32[1,128], index: 8, kind: input, shape index: {}]   ;;  %s1155_s9 = inlined_call_operand.hbm [shape: f32[8,128], index: 9, kind: output, shape index: {}]  }
   0x1   :  { %15 = vsyncpa [#allocation6], 0 }
   0x2   :  { %16 = vsyncpa [#allocation9], 0 }
   0x3   :  { %17 = vsyncpa [#allocation4], 0  ;;  %s1044_s30 = smov [#allocation5]  }
   0x4   :  { %s33_s10 = sshll.u32 %s1044_s30, 4  ;;  %s34_s10 = int_to_ptr.vmem [resolvable:$true] %s33_s10 }
   0x5   :  { %s924_s11 = scalar_lea.vmem %s34_s10, 8192  ;;  %p929_p1 = scmp.lt.s32.totalorder %s34_s10, %s34_s10 }
   0x6   :  { %p925_p0 = scmp.ne.s32.totalorder %s34_s10, %s924_s11  ;;  %p930_p2 = scmp.lt.s32.totalorder %s924_s11, %s924_s11 }
   0x8   :  { %p931_p3 = por %p930_p2, %p929_p1 }
   0xa   :  { %p932_p4 = pnand %p931_p3, %p925_p0 }
   0xc   :  { %935 = shalt.err (!%p932_p4)
}
   0xd   :  { %s1045_s12 = smov 512   ;;  %s1046_s13 = smov 32  }
   0xe   :  { %39 = dma.hbm_to_vmem [thread:$0]  %s1147_s1, 8192, %s34_s10, [#allocation6], %s1045_s12, %s1045_s12, %s1046_s13  }
   0xf   :  { %s1047_s16 = smov [#allocation8]   ;;  %s1048_s18 = smov [#allocation2]  }
  0x10   :  { %s55_s17 = sshll.u32 %s1047_s16, 4  ;;  %s24_s19 = sshll.u32 %s1048_s18, 4  ;;  %s56_s17 = int_to_ptr.vmem [resolvable:$true] %s55_s17  ;;  %s25_s19 = int_to_ptr.vmem [resolvable:$true] %s24_s19 }
  0x11   :  { %s944_s20 = scalar_lea.vmem %s56_s17, 8192  ;;  %p949_p6 = scmp.lt.s32.totalorder %s56_s17, %s56_s17 }
  0x12   :  { %p945_p5 = scmp.ne.s32.totalorder %s56_s17, %s944_s20  ;;  %p950_p7 = scmp.lt.s32.totalorder %s944_s20, %s944_s20 }
  0x14   :  { %p951_p8 = por %p950_p7, %p949_p6 }
  0x16   :  { %p952_p9 = pnand %p951_p8, %p945_p5 }
  0x18   :  { %955 = shalt.err (!%p952_p9)
}
  0x19   :  { %61 = dma.hbm_to_vmem [thread:$0]  %s1149_s3, 8192, %s56_s17, [#allocation9], %s1045_s12, %s1045_s12, %s1046_s13  }
  0x1a   :  { %s964_s23 = scalar_lea.vmem %s25_s19, 128  ;;  %p969_p11 = scmp.lt.s32.totalorder %s25_s19, %s25_s19 }
  0x1b   :  { %p965_p10 = scmp.ne.s32.totalorder %s25_s19, %s964_s23  ;;  %p970_p12 = scmp.lt.s32.totalorder %s964_s23, %s964_s23 }
  0x1d   :  { %p971_p13 = por %p970_p12, %p969_p11 }
  0x1f   :  { %p972_p0 = pnand %p971_p13, %p965_p10 }
  0x21   :  { %975 = shalt.err (!%p972_p0)
}
  0x22   :  { %27 = dma.hbm_to_vmem [thread:$0]  %s1146_s0, 128, %s25_s19, [#allocation3]  }
  0x23   :  { %s1049_s25 = smov [#allocation7]   ;;  %s1050_s27 = smov [#allocation10]  }
  0x24   :  { %s46_s26 = sshll.u32 %s1049_s25, 4  ;;  %s69_s28 = sshll.u32 %s1050_s27, 4  ;;  %s47_s26 = int_to_ptr.vmem [resolvable:$true] %s46_s26  ;;  %s70_s28 = int_to_ptr.vmem [resolvable:$true] %s69_s28 }
  0x25   :  { %s984_s29 = scalar_lea.vmem %s47_s26, 64  ;;  %p989_p2 = scmp.lt.s32.totalorder %s47_s26, %s47_s26 }
  0x26   :  { %p985_p1 = scmp.ne.s32.totalorder %s47_s26, %s984_s29  ;;  %p990_p3 = scmp.lt.s32.totalorder %s984_s29, %s984_s29 }
  0x28   :  { %p991_p4 = por %p990_p3, %p989_p2 }
  0x2a   :  { %p992_p5 = pnand %p991_p4, %p985_p1 }
  0x2c   :  { %995 = shalt.err (!%p992_p5)
}
  0x2d   :  { %49 = dma.hbm_to_vmem [thread:$0]  %s1148_s2, 64, %s47_s26, [#allocation6]  }
  0x2e   :  { %s1004_s10 = scalar_lea.vmem %s70_s28, 8192  ;;  %p1009_p7 = scmp.lt.s32.totalorder %s70_s28, %s70_s28 }
  0x2f   :  { %p1005_p6 = scmp.ne.s32.totalorder %s70_s28, %s1004_s10  ;;  %p1010_p8 = scmp.lt.s32.totalorder %s1004_s10, %s1004_s10 }
  0x31   :  { %p1011_p9 = por %p1010_p8, %p1009_p7 }
  0x33   :  { %p1012_p10 = pnand %p1011_p9, %p1005_p6 }
  0x35   :  { %1015 = shalt.err (!%p1012_p10)
}
  0x36   :  { %s1051_s0 = smov 128   ;;  %s1052_s11 = smov 8  }
  0x37   :  { %75 = dma.hbm_to_vmem [thread:$0]  %s1151_s5, 8192, %s70_s28, [#allocation9], %s1051_s0, %s1051_s0, %s1052_s11  }
  0x38   :  { %1036 = dma.done.wait [#allocation3], 128  }
  0x39   :  { %1037 = vsyncadd [#allocation3], 4294967168 }
  0x3a   :  { %1038 = dma.done.wait [#allocation6], 8256  }
  0x3b   :  { %1039 = vsyncadd [#allocation6], 4294959040 }
  0x3c   :  { %1040 = dma.done.wait [#allocation9], 16384  }
  0x3d   :  { %1041 = vsyncadd [#allocation9], 4294950912  ;;  %v1053_v0 = vmov 0.0   ;;  %v159_v1 = vld [vmem:[#allocation5 + $0x1e8] sm:$0xff]  ;;  %v161_v2 = vld [vmem:[#allocation5 + $0x1f8] sm:$0xff]  ;;  %s1054_s18 = smov [#allocation11]  }
  0x3e   :  { %248 = vmatprep.mubr.f32.mxu0 %v1053_v0  ;;  %319 = vmatprep.mubr.f32.mxu1 %v1053_v0  ;;  %v158_v3 = vld [vmem:[#allocation5 + $0x1e0] sm:$0xff]  ;;  %v160_v4 = vld [vmem:[#allocation5 + $0x1f0] sm:$0xff]  ;;  %v155_v5 = vld [vmem:[#allocation5 + $0x1c8] sm:$0xff]  ;;  %s818_s19 = sshll.u32 %s1054_s18, 4  ;;  %s819_s19 = int_to_ptr.vmem [resolvable:$true] %s818_s19 }
  0x3f   :  { %184 = vmatprep.subr.mxu0 %v159_v1  ;;  %255 = vmatprep.subr.mxu1 %v161_v2  ;;  %v157_v6 = vld [vmem:[#allocation5 + $0x1d8] sm:$0xff]  ;;  %v154_v7 = vld [vmem:[#allocation5 + $0x1c0] sm:$0xff]  ;;  %v156_v8 = vld [vmem:[#allocation5 + $0x1d0] sm:$0xff]  ;;  %s1016_s20 = scalar_lea.vmem %s819_s19, 128  ;;  %p1021_p12 = scmp.lt.s32.totalorder %s819_s19, %s819_s19 }
  0x40   :  { %185 = vmatpush1.msra.mxu0 %v158_v3  ;;  %256 = vmatpush1.msra.mxu1 %v160_v4  ;;  %v151_v9 = vld [vmem:[#allocation5 + $0x1a8] sm:$0xff]  ;;  %v153_v10 = vld [vmem:[#allocation5 + $0x1b8] sm:$0xff]  ;;  %v150_v11 = vld [vmem:[#allocation5 + $0x1a0] sm:$0xff]  ;;  %p1017_p11 = scmp.ne.s32.totalorder %s819_s19, %s1016_s20  ;;  %p1022_p13 = scmp.lt.s32.totalorder %s1016_s20, %s1016_s20 }
  0x41   :  { %186 = vmatprep.subr.mxu0 %v155_v5  ;;  %257 = vmatprep.subr.mxu1 %v157_v6  ;;  %v152_v12 = vld [vmem:[#allocation5 + $0x1b0] sm:$0xff]  ;;  %v147_v13 = vld [vmem:[#allocation5 + $0x188] sm:$0xff]  ;;  %v149_v14 = vld [vmem:[#allocation5 + $0x198] sm:$0xff] }
  0x42   :  { %187 = vmatpush1.msra.mxu0 %v154_v7  ;;  %258 = vmatpush1.msra.mxu1 %v156_v8  ;;  %v146_v15 = vld [vmem:[#allocation5 + $0x180] sm:$0xff]  ;;  %v148_v16 = vld [vmem:[#allocation5 + $0x190] sm:$0xff]  ;;  %v143_v17 = vld [vmem:[#allocation5 + $0x168] sm:$0xff]  ;;  %p1023_p0 = por %p1022_p13, %p1021_p12 }
  0x43   :  { %188 = vmatprep.subr.mxu0 %v151_v9  ;;  %259 = vmatprep.subr.mxu1 %v153_v10  ;;  %v145_v18 = vld [vmem:[#allocation5 + $0x178] sm:$0xff]  ;;  %v142_v19 = vld [vmem:[#allocation5 + $0x160] sm:$0xff]  ;;  %v144_v20 = vld [vmem:[#allocation5 + $0x170] sm:$0xff] }
  0x44   :  { %189 = vmatpush1.msra.mxu0 %v150_v11  ;;  %260 = vmatpush1.msra.mxu1 %v152_v12  ;;  %v139_v21 = vld [vmem:[#allocation5 + $0x148] sm:$0xff]  ;;  %v141_v22 = vld [vmem:[#allocation5 + $0x158] sm:$0xff]  ;;  %v138_v23 = vld [vmem:[#allocation5 + $0x140] sm:$0xff]  ;;  %p1024_p1 = pnand %p1023_p0, %p1017_p11 }
  0x45   :  { %190 = vmatprep.subr.mxu0 %v147_v13  ;;  %261 = vmatprep.subr.mxu1 %v149_v14  ;;  %v140_v24 = vld [vmem:[#allocation5 + $0x150] sm:$0xff]  ;;  %v135_v25 = vld [vmem:[#allocation5 + $0x128] sm:$0xff]  ;;  %v137_v26 = vld [vmem:[#allocation5 + $0x138] sm:$0xff] }
  0x46   :  { %191 = vmatpush1.msra.mxu0 %v146_v15  ;;  %262 = vmatpush1.msra.mxu1 %v148_v16  ;;  %v134_v27 = vld [vmem:[#allocation5 + $0x120] sm:$0xff]  ;;  %v136_v28 = vld [vmem:[#allocation5 + $0x130] sm:$0xff]  ;;  %v131_v29 = vld [vmem:[#allocation5 + $0x108] sm:$0xff] }
  0x47   :  { %192 = vmatprep.subr.mxu0 %v143_v17  ;;  %263 = vmatprep.subr.mxu1 %v145_v18  ;;  %v133_v30 = vld [vmem:[#allocation5 + $0x118] sm:$0xff]  ;;  %v130_v31 = vld [vmem:[#allocation5 + $0x100] sm:$0xff]  ;;  %v132_v32 = vld [vmem:[#allocation5 + $0x110] sm:$0xff] }
  0x48   :  { %193 = vmatpush1.msra.mxu0 %v142_v19  ;;  %264 = vmatpush1.msra.mxu1 %v144_v20  ;;  %v127_v33 = vld [vmem:[#allocation5 + $0xe8] sm:$0xff]  ;;  %v129_v34 = vld [vmem:[#allocation5 + $0xf8] sm:$0xff]  ;;  %v126_v35 = vld [vmem:[#allocation5 + $0xe0] sm:$0xff] }
  0x49   :  { %194 = vmatprep.subr.mxu0 %v139_v21  ;;  %265 = vmatprep.subr.mxu1 %v141_v22  ;;  %v128_v36 = vld [vmem:[#allocation5 + $0xf0] sm:$0xff]  ;;  %v123_v37 = vld [vmem:[#allocation5 + $0xc8] sm:$0xff]  ;;  %v125_v38 = vld [vmem:[#allocation5 + $0xd8] sm:$0xff] }
  0x4a   :  { %195 = vmatpush1.msra.mxu0 %v138_v23  ;;  %266 = vmatpush1.msra.mxu1 %v140_v24  ;;  %v122_v39 = vld [vmem:[#allocation5 + $0xc0] sm:$0xff]  ;;  %v124_v40 = vld [vmem:[#allocation5 + $0xd0] sm:$0xff]  ;;  %v119_v41 = vld [vmem:[#allocation5 + $0xa8] sm:$0xff] }
  0x4b   :  { %196 = vmatprep.subr.mxu0 %v135_v25  ;;  %267 = vmatprep.subr.mxu1 %v137_v26  ;;  %v121_v42 = vld [vmem:[#allocation5 + $0xb8] sm:$0xff]  ;;  %v118_v43 = vld [vmem:[#allocation5 + $0xa0] sm:$0xff]  ;;  %v120_v44 = vld [vmem:[#allocation5 + $0xb0] sm:$0xff] }
  0x4c   :  { %197 = vmatpush1.msra.mxu0 %v134_v27  ;;  %268 = vmatpush1.msra.mxu1 %v136_v28  ;;  %v115_v45 = vld [vmem:[#allocation5 + $0x88] sm:$0xff]  ;;  %v117_v46 = vld [vmem:[#allocation5 + $0x98] sm:$0xff]  ;;  %v114_v47 = vld [vmem:[#allocation5 + $0x80] sm:$0xff] }
  0x4d   :  { %198 = vmatprep.subr.mxu0 %v131_v29  ;;  %269 = vmatprep.subr.mxu1 %v133_v30  ;;  %v116_v48 = vld [vmem:[#allocation5 + $0x90] sm:$0xff]  ;;  %v111_v49 = vld [vmem:[#allocation5 + $0x68] sm:$0xff]  ;;  %v113_v50 = vld [vmem:[#allocation5 + $0x78] sm:$0xff] }
  0x4e   :  { %199 = vmatpush1.msra.mxu0 %v130_v31  ;;  %270 = vmatpush1.msra.mxu1 %v132_v32  ;;  %v110_v51 = vld [vmem:[#allocation5 + $0x60] sm:$0xff]  ;;  %v112_v52 = vld [vmem:[#allocation5 + $0x70] sm:$0xff]  ;;  %v107_v53 = vld [vmem:[#allocation5 + $0x48] sm:$0xff] }
  0x4f   :  { %200 = vmatprep.subr.mxu0 %v127_v33  ;;  %271 = vmatprep.subr.mxu1 %v129_v34  ;;  %v109_v54 = vld [vmem:[#allocation5 + $0x58] sm:$0xff]  ;;  %v106_v55 = vld [vmem:[#allocation5 + $0x40] sm:$0xff]  ;;  %v108_v56 = vld [vmem:[#allocation5 + $0x50] sm:$0xff] }
  0x50   :  { %201 = vmatpush1.msra.mxu0 %v126_v35  ;;  %272 = vmatpush1.msra.mxu1 %v128_v36  ;;  %v103_v57 = vld [vmem:[#allocation5 + $0x28] sm:$0xff]  ;;  %v105_v58 = vld [vmem:[#allocation5 + $0x38] sm:$0xff]  ;;  %v102_v59 = vld [vmem:[#allocation5 + $0x20] sm:$0xff] }
  0x51   :  { %202 = vmatprep.subr.mxu0 %v123_v37  ;;  %273 = vmatprep.subr.mxu1 %v125_v38  ;;  %v104_v60 = vld [vmem:[#allocation5 + $0x30] sm:$0xff]  ;;  %v99_v61 = vld [vmem:[#allocation5 + $0x8] sm:$0xff]  ;;  %v101_v62 = vld [vmem:[#allocation5 + $0x18] sm:$0xff] }
  0x52   :  { %203 = vmatpush1.msra.mxu0 %v122_v39  ;;  %274 = vmatpush1.msra.mxu1 %v124_v40  ;;  %v98_v63 = vld [vmem:[#allocation5] sm:$0xff]  ;;  %v100_v1 = vld [vmem:[#allocation5 + $0x10] sm:$0xff]  ;;  %v1122_v2 = vld [vmem:[#allocation2] sm:$0xff] }
  0x53   :  { %204 = vmatprep.subr.mxu0 %v119_v41  ;;  %275 = vmatprep.subr.mxu1 %v121_v42  ;;  %v387_v3 = vld [vmem:[#allocation8 + $0x1e8] sm:$0xff]  ;;  %v389_v4 = vld [vmem:[#allocation8 + $0x1f8] sm:$0xff]  ;;  %v386_v5 = vld [vmem:[#allocation8 + $0x1e0] sm:$0xff] }
  0x54   :  { %205 = vmatpush1.msra.mxu0 %v118_v43  ;;  %276 = vmatpush1.msra.mxu1 %v120_v44  ;;  %v388_v6 = vld [vmem:[#allocation8 + $0x1f0] sm:$0xff]  ;;  %v383_v7 = vld [vmem:[#allocation8 + $0x1c8] sm:$0xff]  ;;  %v385_v8 = vld [vmem:[#allocation8 + $0x1d8] sm:$0xff] }
  0x55   :  { %206 = vmatprep.subr.mxu0 %v115_v45  ;;  %277 = vmatprep.subr.mxu1 %v117_v46  ;;  %v382_v9 = vld [vmem:[#allocation8 + $0x1c0] sm:$0xff]  ;;  %v384_v10 = vld [vmem:[#allocation8 + $0x1d0] sm:$0xff]  ;;  %v379_v11 = vld [vmem:[#allocation8 + $0x1a8] sm:$0xff] }
  0x56   :  { %207 = vmatpush1.msra.mxu0 %v114_v47  ;;  %278 = vmatpush1.msra.mxu1 %v116_v48  ;;  %v381_v12 = vld [vmem:[#allocation8 + $0x1b8] sm:$0xff]  ;;  %v378_v13 = vld [vmem:[#allocation8 + $0x1a0] sm:$0xff]  ;;  %v380_v14 = vld [vmem:[#allocation8 + $0x1b0] sm:$0xff] }
  0x57   :  { %208 = vmatprep.subr.mxu0 %v111_v49  ;;  %279 = vmatprep.subr.mxu1 %v113_v50  ;;  %v375_v15 = vld [vmem:[#allocation8 + $0x188] sm:$0xff]  ;;  %v377_v16 = vld [vmem:[#allocation8 + $0x198] sm:$0xff]  ;;  %v374_v17 = vld [vmem:[#allocation8 + $0x180] sm:$0xff] }
  0x58   :  { %209 = vmatpush1.msra.mxu0 %v110_v51  ;;  %280 = vmatpush1.msra.mxu1 %v112_v52  ;;  %v376_v18 = vld [vmem:[#allocation8 + $0x190] sm:$0xff]  ;;  %v371_v19 = vld [vmem:[#allocation8 + $0x168] sm:$0xff]  ;;  %v373_v20 = vld [vmem:[#allocation8 + $0x178] sm:$0xff] }
  0x59   :  { %210 = vmatprep.subr.mxu0 %v107_v53  ;;  %281 = vmatprep.subr.mxu1 %v109_v54  ;;  %v370_v21 = vld [vmem:[#allocation8 + $0x160] sm:$0xff]  ;;  %v372_v22 = vld [vmem:[#allocation8 + $0x170] sm:$0xff]  ;;  %v367_v23 = vld [vmem:[#allocation8 + $0x148] sm:$0xff] }
  0x5a   :  { %211 = vmatpush1.msra.mxu0 %v106_v55  ;;  %282 = vmatpush1.msra.mxu1 %v108_v56  ;;  %v369_v24 = vld [vmem:[#allocation8 + $0x158] sm:$0xff]  ;;  %v366_v25 = vld [vmem:[#allocation8 + $0x140] sm:$0xff]  ;;  %v368_v26 = vld [vmem:[#allocation8 + $0x150] sm:$0xff] }
  0x5b   :  { %212 = vmatprep.subr.mxu0 %v103_v57  ;;  %283 = vmatprep.subr.mxu1 %v105_v58  ;;  %v363_v27 = vld [vmem:[#allocation8 + $0x128] sm:$0xff]  ;;  %v365_v28 = vld [vmem:[#allocation8 + $0x138] sm:$0xff]  ;;  %v362_v29 = vld [vmem:[#allocation8 + $0x120] sm:$0xff] }
  0x5c   :  { %213 = vmatpush1.msra.mxu0 %v102_v59  ;;  %284 = vmatpush1.msra.mxu1 %v104_v60  ;;  %v364_v30 = vld [vmem:[#allocation8 + $0x130] sm:$0xff]  ;;  %v359_v31 = vld [vmem:[#allocation8 + $0x108] sm:$0xff]  ;;  %v361_v32 = vld [vmem:[#allocation8 + $0x118] sm:$0xff] }
  0x5d   :  { %214 = vmatprep.subr.mxu0 %v99_v61  ;;  %285 = vmatprep.subr.mxu1 %v101_v62  ;;  %v358_v33 = vld [vmem:[#allocation8 + $0x100] sm:$0xff]  ;;  %v360_v34 = vld [vmem:[#allocation8 + $0x110] sm:$0xff]  ;;  %v355_v35 = vld [vmem:[#allocation8 + $0xe8] sm:$0xff] }
  0x5e   :  { %215 = vmatpush1.msra.mxu0 %v98_v63  ;;  %286 = vmatpush1.msra.mxu1 %v100_v1  ;;  %v357_v36 = vld [vmem:[#allocation8 + $0xf8] sm:$0xff]  ;;  %v354_v37 = vld [vmem:[#allocation8 + $0xe0] sm:$0xff]  ;;  %v356_v38 = vld [vmem:[#allocation8 + $0xf0] sm:$0xff] }
  0x5f   :  { %249 = vmatmul.mubr.f32.vlgmr.msra.gmra.mxu0 %v1122_v2  ;;  %412 = vmatprep.subr.mxu0 %v387_v3  ;;  %v351_v39 = vld [vmem:[#allocation8 + $0xc8] sm:$0xff]  ;;  %v353_v40 = vld [vmem:[#allocation8 + $0xd8] sm:$0xff]  ;;  %v350_v41 = vld [vmem:[#allocation8 + $0xc0] sm:$0xff] }
  0x60   :  { %483 = vmatprep.subr.mxu1 %v389_v4  ;;  %320 = vmatmul.mubr.f32.vlgmr.msra.gmra.mxu1 %v1122_v2  ;;  %v352_v42 = vld [vmem:[#allocation8 + $0xd0] sm:$0xff]  ;;  %v347_v43 = vld [vmem:[#allocation8 + $0xa8] sm:$0xff]  ;;  %v349_v44 = vld [vmem:[#allocation8 + $0xb8] sm:$0xff] }
  0x61   :  { %413 = vmatpush1.msra.mxu0 %v386_v5  ;;  %484 = vmatpush1.msra.mxu1 %v388_v6  ;;  %v346_v45 = vld [vmem:[#allocation8 + $0xa0] sm:$0xff]  ;;  %v348_v46 = vld [vmem:[#allocation8 + $0xb0] sm:$0xff]  ;;  %v343_v47 = vld [vmem:[#allocation8 + $0x88] sm:$0xff] }
  0x62   :  { %414 = vmatprep.subr.mxu0 %v383_v7  ;;  %485 = vmatprep.subr.mxu1 %v385_v8  ;;  %v345_v48 = vld [vmem:[#allocation8 + $0x98] sm:$0xff]  ;;  %v342_v49 = vld [vmem:[#allocation8 + $0x80] sm:$0xff]  ;;  %v344_v50 = vld [vmem:[#allocation8 + $0x90] sm:$0xff] }
  0x63   :  { %415 = vmatpush1.msra.mxu0 %v382_v9  ;;  %486 = vmatpush1.msra.mxu1 %v384_v10  ;;  %v339_v51 = vld [vmem:[#allocation8 + $0x68] sm:$0xff]  ;;  %v341_v52 = vld [vmem:[#allocation8 + $0x78] sm:$0xff]  ;;  %v338_v53 = vld [vmem:[#allocation8 + $0x60] sm:$0xff] }
  0x64   :  { %416 = vmatprep.subr.mxu0 %v379_v11  ;;  %487 = vmatprep.subr.mxu1 %v381_v12  ;;  %v340_v54 = vld [vmem:[#allocation8 + $0x70] sm:$0xff]  ;;  %v335_v55 = vld [vmem:[#allocation8 + $0x48] sm:$0xff]  ;;  %v337_v56 = vld [vmem:[#allocation8 + $0x58] sm:$0xff] }
  0x65   :  { %417 = vmatpush1.msra.mxu0 %v378_v13  ;;  %488 = vmatpush1.msra.mxu1 %v380_v14  ;;  %v334_v57 = vld [vmem:[#allocation8 + $0x40] sm:$0xff]  ;;  %v336_v58 = vld [vmem:[#allocation8 + $0x50] sm:$0xff]  ;;  %v331_v59 = vld [vmem:[#allocation8 + $0x28] sm:$0xff] }
  0x66   :  { %418 = vmatprep.subr.mxu0 %v375_v15  ;;  %489 = vmatprep.subr.mxu1 %v377_v16  ;;  %v333_v60 = vld [vmem:[#allocation8 + $0x38] sm:$0xff]  ;;  %v330_v61 = vld [vmem:[#allocation8 + $0x20] sm:$0xff]  ;;  %v332_v62 = vld [vmem:[#allocation8 + $0x30] sm:$0xff] }
  0x67   :  { %419 = vmatpush1.msra.mxu0 %v374_v17  ;;  %490 = vmatpush1.msra.mxu1 %v376_v18  ;;  %v327_v63 = vld [vmem:[#allocation8 + $0x8] sm:$0xff]  ;;  %v329_v1 = vld [vmem:[#allocation8 + $0x18] sm:$0xff]  ;;  %v326_v3 = vld [vmem:[#allocation8] sm:$0xff] }
  0x68   :  { %420 = vmatprep.subr.mxu0 %v371_v19  ;;  %491 = vmatprep.subr.mxu1 %v373_v20  ;;  %v328_v4 = vld [vmem:[#allocation8 + $0x10] sm:$0xff]  ;;  %v589_v5 = vld [vmem:[#allocation10 + $0xf8] sm:$0xff]  ;;  %v587_v13 = vld [vmem:[#allocation10 + $0xe8] sm:$0xff] }
  0x69   :  { %421 = vmatpush1.msra.mxu0 %v370_v21  ;;  %492 = vmatpush1.msra.mxu1 %v372_v22  ;;  %v621_v6 = vld [vmem:[#allocation10 + $0x1f8] sm:$0xff]  ;;  %v588_v9 = vld [vmem:[#allocation10 + $0xf0] sm:$0xff]  ;;  %v619_v14 = vld [vmem:[#allocation10 + $0x1e8] sm:$0xff] }
  0x6a   :  { %422 = vmatprep.subr.mxu0 %v367_v23  ;;  %493 = vmatprep.subr.mxu1 %v369_v24  ;;  %v573_v7 = vld [vmem:[#allocation10 + $0x78] sm:$0xff]  ;;  %v620_v10 = vld [vmem:[#allocation10 + $0x1f0] sm:$0xff]  ;;  %v571_v15 = vld [vmem:[#allocation10 + $0x68] sm:$0xff] }
  0x6b   :  { %423 = vmatpush1.msra.mxu0 %v366_v25  ;;  %494 = vmatpush1.msra.mxu1 %v368_v26  ;;  %v605_v8 = vld [vmem:[#allocation10 + $0x178] sm:$0xff]  ;;  %v572_v11 = vld [vmem:[#allocation10 + $0x70] sm:$0xff]  ;;  %v603_v16 = vld [vmem:[#allocation10 + $0x168] sm:$0xff] }
  0x6c   :  { %424 = vmatprep.subr.mxu0 %v363_v27  ;;  %495 = vmatprep.subr.mxu1 %v365_v28  ;;  %v604_v12 = vld [vmem:[#allocation10 + $0x170] sm:$0xff]  ;;  %v618_v17 = vld [vmem:[#allocation10 + $0x1e0] sm:$0xff]  ;;  %v585_v20 = vld [vmem:[#allocation10 + $0xd8] sm:$0xff] }
  0x6d   :  { %425 = vmatpush1.msra.mxu0 %v362_v29  ;;  %496 = vmatpush1.msra.mxu1 %v364_v30  ;;  %v570_v18 = vld [vmem:[#allocation10 + $0x60] sm:$0xff]  ;;  %v617_v21 = vld [vmem:[#allocation10 + $0x1d8] sm:$0xff]  ;;  %v584_v24 = vld [vmem:[#allocation10 + $0xd0] sm:$0xff] }
  0x6e   :  { %426 = vmatprep.subr.mxu0 %v359_v31  ;;  %497 = vmatprep.subr.mxu1 %v361_v32  ;;  %v602_v19 = vld [vmem:[#allocation10 + $0x160] sm:$0xff]  ;;  %v569_v22 = vld [vmem:[#allocation10 + $0x58] sm:$0xff]  ;;  %v616_v25 = vld [vmem:[#allocation10 + $0x1d0] sm:$0xff] }
  0x6f   :  { %427 = vmatpush1.msra.mxu0 %v358_v33  ;;  %498 = vmatpush1.msra.mxu1 %v360_v34  ;;  %v601_v23 = vld [vmem:[#allocation10 + $0x158] sm:$0xff]  ;;  %v568_v26 = vld [vmem:[#allocation10 + $0x50] sm:$0xff]  ;;  %v583_v28 = vld [vmem:[#allocation10 + $0xc8] sm:$0xff] }
  0x70   :  { %428 = vmatprep.subr.mxu0 %v355_v35  ;;  %499 = vmatprep.subr.mxu1 %v357_v36  ;;  %v600_v27 = vld [vmem:[#allocation10 + $0x150] sm:$0xff]  ;;  %v615_v29 = vld [vmem:[#allocation10 + $0x1c8] sm:$0xff]  ;;  %v582_v32 = vld [vmem:[#allocation10 + $0xc0] sm:$0xff] }
  0x71   :  { %429 = vmatpush1.msra.mxu0 %v354_v37  ;;  %500 = vmatpush1.msra.mxu1 %v356_v38  ;;  %v567_v30 = vld [vmem:[#allocation10 + $0x48] sm:$0xff]  ;;  %v614_v33 = vld [vmem:[#allocation10 + $0x1c0] sm:$0xff]  ;;  %v581_v36 = vld [vmem:[#allocation10 + $0xb8] sm:$0xff] }
  0x72   :  { %430 = vmatprep.subr.mxu0 %v351_v39  ;;  %501 = vmatprep.subr.mxu1 %v353_v40  ;;  %v599_v31 = vld [vmem:[#allocation10 + $0x148] sm:$0xff]  ;;  %v566_v34 = vld [vmem:[#allocation10 + $0x40] sm:$0xff]  ;;  %v613_v37 = vld [vmem:[#allocation10 + $0x1b8] sm:$0xff] }
  0x73   :  { %431 = vmatpush1.msra.mxu0 %v350_v41  ;;  %502 = vmatpush1.msra.mxu1 %v352_v42  ;;  %v598_v35 = vld [vmem:[#allocation10 + $0x140] sm:$0xff]  ;;  %v565_v38 = vld [vmem:[#allocation10 + $0x38] sm:$0xff]  ;;  %v580_v40 = vld [vmem:[#allocation10 + $0xb0] sm:$0xff] }
  0x74   :  { %432 = vmatprep.subr.mxu0 %v347_v43  ;;  %503 = vmatprep.subr.mxu1 %v349_v44  ;;  %v597_v39 = vld [vmem:[#allocation10 + $0x138] sm:$0xff]  ;;  %v612_v41 = vld [vmem:[#allocation10 + $0x1b0] sm:$0xff]  ;;  %v579_v44 = vld [vmem:[#allocation10 + $0xa8] sm:$0xff] }
  0x75   :  { %433 = vmatpush1.msra.mxu0 %v346_v45  ;;  %504 = vmatpush1.msra.mxu1 %v348_v46  ;;  %v564_v42 = vld [vmem:[#allocation10 + $0x30] sm:$0xff]  ;;  %v611_v45 = vld [vmem:[#allocation10 + $0x1a8] sm:$0xff] }
  0x76   :  { %434 = vmatprep.subr.mxu0 %v343_v47  ;;  %505 = vmatprep.subr.mxu1 %v345_v48  ;;  %v596_v43 = vld [vmem:[#allocation10 + $0x130] sm:$0xff]  ;;  %v563_v46 = vld [vmem:[#allocation10 + $0x28] sm:$0xff]  ;;  %v578_v48 = vld [vmem:[#allocation10 + $0xa0] sm:$0xff] }
  0x77   :  { %435 = vmatpush1.msra.mxu0 %v342_v49  ;;  %506 = vmatpush1.msra.mxu1 %v344_v50  ;;  %v595_v47 = vld [vmem:[#allocation10 + $0x128] sm:$0xff]  ;;  %v610_v49 = vld [vmem:[#allocation10 + $0x1a0] sm:$0xff] }
  0x78   :  { %436 = vmatprep.subr.mxu0 %v339_v51  ;;  %507 = vmatprep.subr.mxu1 %v341_v52  ;;  %v562_v50 = vld [vmem:[#allocation10 + $0x20] sm:$0xff]  ;;  %v577_v52 = vld [vmem:[#allocation10 + $0x98] sm:$0xff] }
  0x79   :  { %437 = vmatpush1.msra.mxu0 %v338_v53  ;;  %508 = vmatpush1.msra.mxu1 %v340_v54  ;;  %v594_v51 = vld [vmem:[#allocation10 + $0x120] sm:$0xff]  ;;  %v609_v53 = vld [vmem:[#allocation10 + $0x198] sm:$0xff] }
  0x7a   :  { %438 = vmatprep.subr.mxu0 %v335_v55  ;;  %509 = vmatprep.subr.mxu1 %v337_v56  ;;  %v561_v54 = vld [vmem:[#allocation10 + $0x18] sm:$0xff]  ;;  %v576_v56 = vld [vmem:[#allocation10 + $0x90] sm:$0xff] }
  0x7b   :  { %439 = vmatpush1.msra.mxu0 %v334_v57  ;;  %510 = vmatpush1.msra.mxu1 %v336_v58  ;;  %v593_v55 = vld [vmem:[#allocation10 + $0x118] sm:$0xff]  ;;  %v608_v57 = vld [vmem:[#allocation10 + $0x190] sm:$0xff] }
  0x7c   :  { %440 = vmatprep.subr.mxu0 %v331_v59  ;;  %511 = vmatprep.subr.mxu1 %v333_v60  ;;  %v560_v58 = vld [vmem:[#allocation10 + $0x10] sm:$0xff]  ;;  %v575_v60 = vld [vmem:[#allocation10 + $0x88] sm:$0xff] }
  0x7d   :  { %441 = vmatpush1.msra.mxu0 %v330_v61  ;;  %512 = vmatpush1.msra.mxu1 %v332_v62  ;;  %v592_v59 = vld [vmem:[#allocation10 + $0x110] sm:$0xff]  ;;  %v607_v61 = vld [vmem:[#allocation10 + $0x188] sm:$0xff] }
  0x7e   :  { %442 = vmatprep.subr.mxu0 %v327_v63  ;;  %513 = vmatprep.subr.mxu1 %v329_v1  ;;  %v559_v62 = vld [vmem:[#allocation10 + $0x8] sm:$0xff]  ;;  %v574_v1 = vld [vmem:[#allocation10 + $0x80] sm:$0xff] }
  0x7f   :  { %443 = vmatpush1.msra.mxu0 %v326_v3  ;;  %476 = vmatprep.mubr.f32.mxu0 %v1053_v0  ;;  %v591_v63 = vld [vmem:[#allocation10 + $0x108] sm:$0xff]  ;;  %v606_v3 = vld [vmem:[#allocation10 + $0x180] sm:$0xff] }
  0x80   :  { %514 = vmatpush1.msra.mxu1 %v328_v4  ;;  %547 = vmatprep.mubr.f32.mxu1 %v1053_v0  ;;  %v558_v4 = vld [vmem:[#allocation10] sm:$0xff] }
  0x81   :  { %477 = vmatmul.mubr.f32.vlgmr.msra.gmra.mxu0 %v1122_v2  ;;  %548 = vmatmul.mubr.f32.vlgmr.msra.gmra.mxu1 %v1122_v2  ;;  %v586_v2 = vld [vmem:[#allocation10 + $0xe0] sm:$0xff] }
  0x82   :  { %833 = vmatprep.subr.mxu0 %v589_v5  ;;  %868 = vmatprep.subr.mxu1 %v621_v6  ;;  %v590_v5 = vld [vmem:[#allocation10 + $0x100] sm:$0xff]  ;;  %v164_v6 = vlaneseq }
  0x83   :  { %834 = vmatpush3.msra.mxu0 %v573_v7  ;;  %869 = vmatpush3.msra.mxu1 %v605_v8 }
  0x84   :  { %835 = vmatprep.subr.mxu0 %v588_v9  ;;  %870 = vmatprep.subr.mxu1 %v620_v10  ;;  %v165_v7 = vshrl.u32 %v164_v6, 7 }
  0x85   :  { %836 = vmatpush3.msra.mxu0 %v572_v11  ;;  %871 = vmatpush3.msra.mxu1 %v604_v12  ;;  %v390_v12 = vld [vmem:[%s1150_s4] sm:$0xf] }
  0x86   :  { %837 = vmatprep.subr.mxu0 %v587_v13  ;;  %872 = vmatprep.subr.mxu1 %v619_v14  ;;  %v170_v10 = vsub.s32 1, %v165_v7  ;;  %v178_v11 = vsub.s32 3, %v165_v7  ;;  %v162_v13 = vld [vmem:[#allocation7] sm:$0xf]  ;;  %v166_v14 = vsub.s32 0, %v165_v7  ;;  %vm771_vm0 = vcmp.lt.s32.totalorder %v165_v7, 2 }
  0x87   :  { %838 = vmatpush3.msra.mxu0 %v571_v15  ;;  %873 = vmatpush3.msra.mxu1 %v603_v16  ;;  %v174_v15 = vsub.s32 2, %v165_v7 }
  0x88   :  { %839 = vmatprep.subr.mxu0 %v586_v2  ;;  %874 = vmatprep.subr.mxu1 %v618_v17  ;;  %v395_v17 = vrot.slane %v390_v12, %v166_v14 }
  0x89   :  { %840 = vmatpush3.msra.mxu0 %v570_v18  ;;  %875 = vmatpush3.msra.mxu1 %v602_v19  ;;  %v403_v18 = vrot.slane %v390_v12, %v174_v15  ;;  %v171_v19 = vrot.slane %v162_v13, %v170_v10 }
  0x8a   :  { %841 = vmatprep.subr.mxu0 %v585_v20  ;;  %876 = vmatprep.subr.mxu1 %v617_v21  ;;  %v179_v20 = vrot.slane %v162_v13, %v178_v11  ;;  %v399_v21 = vrot.slane %v390_v12, %v170_v10  ;;  %v832_v10 = vld [vmem:[%s1154_s8] ss:$0 sm:$0xff] }
  0x8b   :  { %842 = vmatpush3.msra.mxu0 %v569_v22  ;;  %877 = vmatpush3.msra.mxu1 %v601_v23  ;;  %v407_v22 = vrot.slane %v390_v12, %v178_v11  ;;  %v167_v23 = vrot.slane %v162_v13, %v166_v14 }
  0x8c   :  { %843 = vmatprep.subr.mxu0 %v584_v24  ;;  %878 = vmatprep.subr.mxu1 %v616_v25  ;;  %v175_v24 = vrot.slane %v162_v13, %v174_v15 }
  0x8d   :  { %844 = vmatpush3.msra.mxu0 %v568_v26  ;;  %879 = vmatpush3.msra.mxu1 %v600_v27 }
  0x8e   :  { %845 = vmatprep.subr.mxu0 %v583_v28  ;;  %880 = vmatprep.subr.mxu1 %v615_v29 }
  0x8f   :  { %846 = vmatpush3.msra.mxu0 %v567_v30  ;;  %881 = vmatpush3.msra.mxu1 %v599_v31 }
  0x90   :  { %847 = vmatprep.subr.mxu0 %v582_v32  ;;  %882 = vmatprep.subr.mxu1 %v614_v33 }
  0x91   :  { %848 = vmatpush3.msra.mxu0 %v566_v34  ;;  %883 = vmatpush3.msra.mxu1 %v598_v35 }
  0x92   :  { %849 = vmatprep.subr.mxu0 %v581_v36  ;;  %884 = vmatprep.subr.mxu1 %v613_v37 }
  0x93   :  { %850 = vmatpush3.msra.mxu0 %v565_v38  ;;  %885 = vmatpush3.msra.mxu1 %v597_v39 }
  0x94   :  { %851 = vmatprep.subr.mxu0 %v580_v40  ;;  %886 = vmatprep.subr.mxu1 %v612_v41 }
  0x95   :  { %852 = vmatpush3.msra.mxu0 %v564_v42  ;;  %887 = vmatpush3.msra.mxu1 %v596_v43  ;;  %v829_v43 = vld [vmem:[%s1152_s6] ss:$0 sm:$0xff] }
  0x96   :  { %853 = vmatprep.subr.mxu0 %v579_v44  ;;  %888 = vmatprep.subr.mxu1 %v611_v45 }
  0x97   :  { %854 = vmatpush3.msra.mxu0 %v563_v46  ;;  %889 = vmatpush3.msra.mxu1 %v595_v47 }
  0x98   :  { %855 = vmatprep.subr.mxu0 %v578_v48  ;;  %890 = vmatprep.subr.mxu1 %v610_v49  ;;  %v830_v49 = vsel %vm771_vm0, 1.0, %v1053_v0 }
  0x99   :  { %856 = vmatpush3.msra.mxu0 %v562_v50  ;;  %891 = vmatpush3.msra.mxu1 %v594_v51 }
  0x9a   :  { %857 = vmatprep.subr.mxu0 %v577_v52  ;;  %892 = vmatprep.subr.mxu1 %v609_v53 }
  0x9b   :  { %858 = vmatpush3.msra.mxu0 %v561_v54  ;;  %893 = vmatpush3.msra.mxu1 %v593_v55 }
  0x9c   :  { %859 = vmatprep.subr.mxu0 %v576_v56  ;;  %894 = vmatprep.subr.mxu1 %v608_v57 }
  0x9d   :  { %860 = vmatpush3.msra.mxu0 %v560_v58  ;;  %895 = vmatpush3.msra.mxu1 %v592_v59 }
  0x9e   :  { %861 = vmatprep.subr.mxu0 %v575_v60  ;;  %896 = vmatprep.subr.mxu1 %v607_v61 }
  0x9f   :  { %862 = vmatpush3.msra.mxu0 %v559_v62  ;;  %897 = vmatpush3.msra.mxu1 %v591_v63 }
  0xa0   :  { %863 = vmatprep.subr.mxu0 %v574_v1  ;;  %898 = vmatprep.subr.mxu1 %v606_v3 }
  0xa1   :  { %864 = vmatpush3.msra.mxu0 %v558_v4  ;;  %899 = vmatpush3.msra.mxu1 %v590_v5 }
 0x11f   :  { %v250_v8 = vpop.f32.mrf.mxu0 }
 0x120   :  { %v321_v9 = vpop.f32.mrf.mxu1  ;;  %v251_v35 = vadd.f32 %v250_v8, %v167_v23  ;;  %v831_v8 = vld [vmem:[%s1153_s7] ss:$0 sm:$0xff] }
 0x121   :  { %v252_v16 = vpop.f32.mrf.mxu0  ;;  %v322_v36 = vadd.f32 %v321_v9, %v175_v24 }
 0x122   :  { %v323_v2 = vpop.f32.mrf.mxu1  ;;  %v253_v31 = vadd.f32 %v252_v16, %v171_v19 }
 0x123   :  { %v324_v32 = vadd.f32 %v323_v2, %v179_v20 }
 0x141   :  { %v478_v25 = vpop.f32.mrf.mxu0  ;;  %v549_v26 = vpop.f32.mrf.mxu1 }
 0x142   :  { %v479_v27 = vadd.f32 %v478_v25, %v395_v17  ;;  %v550_v28 = vadd.f32 %v549_v26, %v403_v18 }
 0x143   :  { %v480_v29 = vpop.f32.mrf.mxu0  ;;  %v551_v30 = vpop.f32.mrf.mxu1 }
 0x144   :  { %v481_v33 = vadd.f32 %v480_v29, %v399_v21  ;;  %v552_v34 = vadd.f32 %v551_v30, %v407_v22  ;;  %v554_v39 = vmul.f32 %v479_v27, %v251_v35  ;;  %v556_v40 = vmul.f32 %v550_v28, %v322_v36 }
 0x146   :  { %v555_v37 = vmul.f32 %v481_v33, %v253_v31  ;;  %v557_v38 = vmul.f32 %v552_v34, %v324_v32 }
 0x148   :  { %693 = vmatprep.mubr.f32.mxu0 %v555_v37  ;;  %763 = vmatprep.mubr.f32.mxu1 %v557_v38 }
 0x149   :  { %694 = vmatmul.mubr.f32.vlgmr.msra.gmra.mxu0 %v554_v39  ;;  %764 = vmatmul.mubr.f32.vlgmr.msra.gmra.mxu1 %v556_v40 }
 0x209   :  { %v865_v41 = vpop.f32.mrf.mxu0  ;;  %v900_v42 = vpop.f32.mrf.mxu1 }
 0x20b   :  { %v866_v44 = vpop.f32.mrf.mxu0  ;;  %v901_v45 = vpop.f32.mrf.mxu1 }
 0x20c   :  { %v867_v46 = vadd.f32 %v866_v44, %v865_v41  ;;  %v902_v48 = vadd.f32 %v901_v45, %v900_v42 }
 0x20e   :  { %v696_v47 = vadd.f32 %v867_v46, %v829_v43 }
 0x210   :  { %v766_v50 = vadd.f32 %v902_v48, %v696_v47 }
 0x212   :  { %v774_v51 = vmul.f32 %v830_v49, %v766_v50 }
 0x214   :  { %v775_v52 = vrot.slane %v774_v51, 4 }
 0x216   :  { %v776_v53 = vadd.f32 %v775_v52, %v774_v51 }
 0x218   :  { %v777_v54 = vrot.slane %v776_v53, 2 }
 0x21a   :  { %v778_v55 = vadd.f32 %v777_v54, %v776_v53 }
 0x21c   :  { %v779_v56 = vrot.slane %v778_v55, 1 }
 0x21e   :  { %v780_v57 = vadd.f32 %v779_v56, %v778_v55 }
 0x220   :  { %v781_v58 = vmul.f32 0.5, %v780_v57 }
 0x222   :  { %v782_v59 = vsub.f32 %v766_v50, %v781_v58 }
 0x224   :  { %v783_v60 = vmul.f32 %v830_v49, %v782_v59 }
 0x226   :  { %v784_v61 = vmul.f32 %v783_v60, %v783_v60 }
 0x228   :  { %v785_v62 = vrot.slane %v784_v61, 4 }
 0x22a   :  { %v786_v63 = vadd.f32 %v785_v62, %v784_v61 }
 0x22c   :  { %v787_v1 = vrot.slane %v786_v63, 2 }
 0x22e   :  { %v788_v3 = vadd.f32 %v787_v1, %v786_v63 }
 0x230   :  { %v789_v4 = vrot.slane %v788_v3, 1 }
 0x232   :  { %v790_v5 = vadd.f32 %v789_v4, %v788_v3 }
 0x234   :  { %v791_v6 = vmul.f32 0.5, %v790_v5 }
 0x236   :  { %v792_v0 = vadd.f32 1e-05, %v791_v6 }
 0x238   :  { %914 = vrsqrt.f32 %v792_v0 }
 0x245   :  { %v915_v7 = vpop.eup %914 }
 0x246   :  { %v794_v9 = vmul.f32 %v915_v7, %v782_v59 }
 0x248   :  { %v802_v11 = vmul.f32 %v831_v8, %v794_v9 }
 0x24a   :  { %v810_v12 = vadd.f32 %v832_v10, %v802_v11 }
 0x24c   :  { %811 = vst [vmem:[#allocation11] sm:$0xff] %v810_v12 }
 0x24d   :  { %1027 = shalt.err (!%p1024_p1)
}
 0x24e   :  { %821 = dma.vmem_to_hbm [thread:$0]  %s819_s19, 128, %s1155_s9, [#allocation4]  }
 0x24f   :  { %1042 = dma.done.wait [#allocation4], 128  }
 0x250   :  { %1043 = vsyncadd [#allocation4], 4294967168 }
 0x251   :  { %825 = vsyncpa [#allocation3], 1 }
 0x252   :  { %826 = vsyncpa [#allocation6], 1 }
 0x253   :  { %827 = vsyncpa [#allocation9], 1 }
 0x254   :  { %828 = vsyncpa [#allocation4], 1 }

</bundles_post_ra>
